<compile_context>
chip_gen: v5e
topology: v5e:2x2
jax: 0.10.0
libtpu: 0.0.40
codegen_flags: <defaults>
</compile_context>

<pallas_src>
import functools

import jax
import jax.numpy as jnp
from jax.experimental import pallas as pl
from jax.experimental.pallas import tpu as pltpu

LANES = 128          # samples per output row (each sample occupies 2 lanes)
WIDTH = 2 * LANES    # lane width of input/output tiles
HIDDEN = 4
OUT = 2
# params layout: [w1(4) | b1(4) | w2 row-major (4*2) | b2(2)]
P_W1 = 0
P_B1 = HIDDEN
P_W2 = 2 * HIDDEN
P_B2 = 2 * HIDDEN + HIDDEN * OUT
N_PARAMS = P_B2 + OUT  # 18


def mlp_kernel(params_ref, x_ref, o_ref):
    """Per-lane MLP on the VPU, classes interleaved across even/odd lanes.

    params_ref: SMEM f32[18]
    x_ref:      VMEM [tn, 256]  lane c of row r holds sample (r*128 + c//2)
    o_ref:      VMEM [tn, 256]  lane c of row r holds class (c % 2) of that sample
    """
    x = x_ref[...].astype(jnp.float32)                       # (tn, 256)

    lane = jax.lax.broadcasted_iota(jnp.int32, (1, WIDTH), 1)
    is_odd = (lane & 1) == 1                                  # class-1 lanes

    # Accumulator initialized with the (parity-selected) output bias.
    b2v = jnp.where(is_odd, params_ref[P_B2 + 1], params_ref[P_B2 + 0])
    acc = jnp.broadcast_to(b2v, x.shape)

    for j in range(HIDDEN):                                   # tiny static unroll
        h = jnp.maximum(x * params_ref[P_W1 + j] + params_ref[P_B1 + j], 0.0)
        w2v = jnp.where(is_odd,
                        params_ref[P_W2 + 2 * j + 1],         # w2[j, 1]
                        params_ref[P_W2 + 2 * j + 0])         # w2[j, 0]
        acc = acc + h * w2v

    o_ref[...] = acc.astype(o_ref.dtype)


@functools.partial(jax.jit, static_argnames=("block_rows",))
def temp_classifier_forward(x, w1, b1, w2, b2, *, block_rows=2048):
    """x: (N, 1); w1: (1,4); b1: (1,4); w2: (4,2); b2: (1,2) -> (N, 2)."""
    xcol = x.reshape(-1, 1)
    n = xcol.shape[0]
    dtype = xcol.dtype

    # ---- tile sizing -------------------------------------------------------
    rows = max(1, pl.cdiv(n, LANES))                  # 128 samples per row
    tn = min(block_rows, pl.cdiv(rows, 2))            # >=2 blocks when possible (v7x)
    tn = max(8, pl.cdiv(tn, 8) * 8)                   # sublane multiple
    num_blocks = pl.cdiv(rows, tn)
    tn = max(8, pl.cdiv(pl.cdiv(rows, num_blocks), 8) * 8)   # even out padding
    rows_padded = num_blocks * tn

    # ---- duplicated, interleave-ready input layout ---------------------------
    # flat order [x0, x0, x1, x1, ...]; row r lane c <-> sample r*128 + c//2.
    x_dup = jnp.broadcast_to(xcol, (n, OUT)).reshape(-1)
    pad = rows_padded * WIDTH - OUT * n
    if pad:
        x_dup = jnp.pad(x_dup, (0, pad))
    x2d = x_dup.reshape(rows_padded, WIDTH)

    # ---- pack the 18 parameters into one SMEM blob ---------------------------
    params = jnp.concatenate([
        w1.reshape(-1).astype(jnp.float32),   # 4
        b1.reshape(-1).astype(jnp.float32),   # 4
        w2.reshape(-1).astype(jnp.float32),   # 8, row-major (j, k)
        b2.reshape(-1).astype(jnp.float32),   # 2
    ])

    out2d = pl.pallas_call(
        mlp_kernel,
        out_shape=jax.ShapeDtypeStruct((rows_padded, WIDTH), dtype),
        grid=(num_blocks,),
        in_specs=[
            pl.BlockSpec(memory_space=pltpu.SMEM),            # params f32[18]
            pl.BlockSpec((tn, WIDTH), lambda i: (i, 0)),      # x tile
        ],
        out_specs=pl.BlockSpec((tn, WIDTH), lambda i: (i, 0)),
        compiler_params=pltpu.CompilerParams(
            dimension_semantics=("parallel",),
            allow_input_fusion=[False, True],  # fold bcast/pad into the input DMA
        ),
    )(params, x2d)

    # Row-major flatten of (rows, 256) is already per-sample class-interleaved.
    out = out2d.reshape(rows_padded * LANES, OUT)     # free contiguous reshape
    if rows_padded * LANES != n:
        out = out[:n]
    return out


def init_params(key):
    """Deterministic init mimicking nn.Linear's uniform(-1/sqrt(fan_in), ...)."""
    k1, k2, k3, k4 = jax.random.split(key, 4)
    bound1 = 1.0                                   # Linear(1, 4): fan_in = 1
    w1 = jax.random.uniform(k1, (1, 4), jnp.float32, -bound1, bound1)
    b1 = jax.random.uniform(k2, (1, 4), jnp.float32, -bound1, bound1)
    bound2 = 1.0 / jnp.sqrt(4.0)                   # Linear(4, 2): fan_in = 4
    w2 = jax.random.uniform(k3, (4, 2), jnp.float32, -bound2, bound2)
    b2 = jax.random.uniform(k4, (1, 2), jnp.float32, -bound2, bound2)
    return w1, b1, w2, b2


if __name__ == "__main__":
    key = jax.random.PRNGKey(0)
    kx, kp = jax.random.split(key)
    w1, b1, w2, b2 = init_params(kp)

    def ref_fwd(x):
        return jnp.maximum(x.astype(jnp.float32) @ w1 + b1, 0.0) @ w2 + b2

    # Small deterministic batch of scalar "temperature" features: (N, 1).
    x = jax.random.normal(kx, (8, 1), dtype=jnp.float32)
    out = jax.block_until_ready(temp_classifier_forward(x, w1, b1, w2, b2))
    assert out.shape == (8, 2)
    assert jnp.allclose(out, ref_fwd(x), atol=1e-5, rtol=1e-5)

    # Tile-aligned batch: pad-free input, free output reshape, 2 grid blocks.
    x1 = jax.random.normal(kx, (2048, 1), dtype=jnp.float32)
    out1 = jax.block_until_ready(temp_classifier_forward(x1, w1, b1, w2, b2))
    assert out1.shape == (2048, 2)
    assert jnp.allclose(out1, ref_fwd(x1), atol=1e-5, rtol=1e-5)

    # Unaligned batch + tiny block_rows to exercise padding and a multi-step grid.
    x2 = jax.random.normal(kx, (3000, 1), dtype=jnp.float32)
    out2 = jax.block_until_ready(
        temp_classifier_forward(x2, w1, b1, w2, b2, block_rows=8)
    )
    assert out2.shape == (3000, 2)
    assert jnp.allclose(out2, ref_fwd(x2), atol=1e-5, rtol=1e-5)

    print("KERNEL_OK")
</pallas_src>

<mosaic_0001>
module attributes {stable_mosaic.version = 11 : i64} {
  func.func @mlp_kernel(%arg0: i32, %arg1: memref<18xf32, #tpu.memory_space<smem>>, %arg2: memref<8x256xf32, #tpu.memory_space<vmem>>, %arg3: memref<8x256xf32, #tpu.memory_space<vmem>>) attributes {dimension_semantics = [#tpu.dimension_semantics<parallel>], iteration_bounds = array<i64: 1>, scalar_prefetch = 0 : i64, scratch_operands = 0 : i64, tpu.core_type = #tpu.core_type<tc>, window_params = [{transform_indices = @transform_0, window_bounds = array<i64: 18>}, {transform_indices = @transform_1, window_bounds = array<i64: 8, 256>}, {transform_indices = @transform_2, window_bounds = array<i64: 8, 256>}]} {
    %c0 = arith.constant 0 : index
    %c0_0 = arith.constant 0 : index
    %0 = vector.load %arg2[%c0, %c0_0] : memref<8x256xf32, #tpu.memory_space<vmem>>, vector<8x256xf32>
    %1 = tpu.iota {dimensions = array<i32: 1>} : vector<1x256xi32>
    %c1_i32 = arith.constant 1 : i32
    %2 = vector.broadcast %c1_i32 : i32 to vector<1x256xi32>
    %3 = arith.andi %1, %2 : vector<1x256xi32>
    %c1_i32_1 = arith.constant 1 : i32
    %4 = vector.broadcast %c1_i32_1 : i32 to vector<1x256xi32>
    %5 = arith.cmpi eq, %3, %4 : vector<1x256xi32>
    %c17 = arith.constant 17 : index
    %6 = memref.load %arg1[%c17] : memref<18xf32, #tpu.memory_space<smem>>
    %c16 = arith.constant 16 : index
    %7 = memref.load %arg1[%c16] : memref<18xf32, #tpu.memory_space<smem>>
    %8 = vector.broadcast %6 : f32 to vector<1x256xf32>
    %9 = vector.broadcast %7 : f32 to vector<1x256xf32>
    %10 = arith.select %5, %8, %9 : vector<1x256xi1>, vector<1x256xf32>
    %11 = vector.shape_cast %10 : vector<1x256xf32> to vector<1x256xf32>
    %12 = vector.broadcast %11 : vector<1x256xf32> to vector<8x256xf32>
    %c0_2 = arith.constant 0 : index
    %13 = memref.load %arg1[%c0_2] : memref<18xf32, #tpu.memory_space<smem>>
    %14 = vector.broadcast %13 : f32 to vector<8x256xf32>
    %15 = arith.mulf %0, %14 : vector<8x256xf32>
    %c4 = arith.constant 4 : index
    %16 = memref.load %arg1[%c4] : memref<18xf32, #tpu.memory_space<smem>>
    %17 = vector.broadcast %16 : f32 to vector<8x256xf32>
    %18 = arith.addf %15, %17 : vector<8x256xf32>
    %cst = arith.constant 0.000000e+00 : f32
    %19 = vector.broadcast %cst : f32 to vector<8x256xf32>
    %20 = arith.maximumf %18, %19 : vector<8x256xf32>
    %c9 = arith.constant 9 : index
    %21 = memref.load %arg1[%c9] : memref<18xf32, #tpu.memory_space<smem>>
    %c8 = arith.constant 8 : index
    %22 = memref.load %arg1[%c8] : memref<18xf32, #tpu.memory_space<smem>>
    %23 = vector.broadcast %21 : f32 to vector<1x256xf32>
    %24 = vector.broadcast %22 : f32 to vector<1x256xf32>
    %25 = arith.select %5, %23, %24 : vector<1x256xi1>, vector<1x256xf32>
    %26 = vector.broadcast %25 : vector<1x256xf32> to vector<8x256xf32>
    %27 = arith.mulf %20, %26 : vector<8x256xf32>
    %28 = arith.addf %12, %27 : vector<8x256xf32>
    %c1 = arith.constant 1 : index
    %29 = memref.load %arg1[%c1] : memref<18xf32, #tpu.memory_space<smem>>
    %30 = vector.broadcast %29 : f32 to vector<8x256xf32>
    %31 = arith.mulf %0, %30 : vector<8x256xf32>
    %c5 = arith.constant 5 : index
    %32 = memref.load %arg1[%c5] : memref<18xf32, #tpu.memory_space<smem>>
    %33 = vector.broadcast %32 : f32 to vector<8x256xf32>
    %34 = arith.addf %31, %33 : vector<8x256xf32>
    %cst_3 = arith.constant 0.000000e+00 : f32
    %35 = vector.broadcast %cst_3 : f32 to vector<8x256xf32>
    %36 = arith.maximumf %34, %35 : vector<8x256xf32>
    %c11 = arith.constant 11 : index
    %37 = memref.load %arg1[%c11] : memref<18xf32, #tpu.memory_space<smem>>
    %c10 = arith.constant 10 : index
    %38 = memref.load %arg1[%c10] : memref<18xf32, #tpu.memory_space<smem>>
    %39 = vector.broadcast %37 : f32 to vector<1x256xf32>
    %40 = vector.broadcast %38 : f32 to vector<1x256xf32>
    %41 = arith.select %5, %39, %40 : vector<1x256xi1>, vector<1x256xf32>
    %42 = vector.broadcast %41 : vector<1x256xf32> to vector<8x256xf32>
    %43 = arith.mulf %36, %42 : vector<8x256xf32>
    %44 = arith.addf %28, %43 : vector<8x256xf32>
    %c2 = arith.constant 2 : index
    %45 = memref.load %arg1[%c2] : memref<18xf32, #tpu.memory_space<smem>>
    %46 = vector.broadcast %45 : f32 to vector<8x256xf32>
    %47 = arith.mulf %0, %46 : vector<8x256xf32>
    %c6 = arith.constant 6 : index
    %48 = memref.load %arg1[%c6] : memref<18xf32, #tpu.memory_space<smem>>
    %49 = vector.broadcast %48 : f32 to vector<8x256xf32>
    %50 = arith.addf %47, %49 : vector<8x256xf32>
    %cst_4 = arith.constant 0.000000e+00 : f32
    %51 = vector.broadcast %cst_4 : f32 to vector<8x256xf32>
    %52 = arith.maximumf %50, %51 : vector<8x256xf32>
    %c13 = arith.constant 13 : index
    %53 = memref.load %arg1[%c13] : memref<18xf32, #tpu.memory_space<smem>>
    %c12 = arith.constant 12 : index
    %54 = memref.load %arg1[%c12] : memref<18xf32, #tpu.memory_space<smem>>
    %55 = vector.broadcast %53 : f32 to vector<1x256xf32>
    %56 = vector.broadcast %54 : f32 to vector<1x256xf32>
    %57 = arith.select %5, %55, %56 : vector<1x256xi1>, vector<1x256xf32>
    %58 = vector.broadcast %57 : vector<1x256xf32> to vector<8x256xf32>
    %59 = arith.mulf %52, %58 : vector<8x256xf32>
    %60 = arith.addf %44, %59 : vector<8x256xf32>
    %c3 = arith.constant 3 : index
    %61 = memref.load %arg1[%c3] : memref<18xf32, #tpu.memory_space<smem>>
    %62 = vector.broadcast %61 : f32 to vector<8x256xf32>
    %63 = arith.mulf %0, %62 : vector<8x256xf32>
    %c7 = arith.constant 7 : index
    %64 = memref.load %arg1[%c7] : memref<18xf32, #tpu.memory_space<smem>>
    %65 = vector.broadcast %64 : f32 to vector<8x256xf32>
    %66 = arith.addf %63, %65 : vector<8x256xf32>
    %cst_5 = arith.constant 0.000000e+00 : f32
    %67 = vector.broadcast %cst_5 : f32 to vector<8x256xf32>
    %68 = arith.maximumf %66, %67 : vector<8x256xf32>
    %c15 = arith.constant 15 : index
    %69 = memref.load %arg1[%c15] : memref<18xf32, #tpu.memory_space<smem>>
    %c14 = arith.constant 14 : index
    %70 = memref.load %arg1[%c14] : memref<18xf32, #tpu.memory_space<smem>>
    %71 = vector.broadcast %69 : f32 to vector<1x256xf32>
    %72 = vector.broadcast %70 : f32 to vector<1x256xf32>
    %73 = arith.select %5, %71, %72 : vector<1x256xi1>, vector<1x256xf32>
    %74 = vector.broadcast %73 : vector<1x256xf32> to vector<8x256xf32>
    %75 = arith.mulf %68, %74 : vector<8x256xf32>
    %76 = arith.addf %60, %75 : vector<8x256xf32>
    %c0_6 = arith.constant 0 : index
    %c0_7 = arith.constant 0 : index
    %77 = vector.load %arg3[%c0_6, %c0_7] : memref<8x256xf32, #tpu.memory_space<vmem>>, vector<8x256xf32>
    tpu.vector_store %arg3[%c0_6, %c0_7], %76 {strides = array<i32>} : memref<8x256xf32, #tpu.memory_space<vmem>>, vector<8x256xf32>,
    return
  }
  func.func @transform_0(%arg0: i32) -> i32 {
    %c0_i32 = arith.constant 0 : i32
    %c0_i32_0 = arith.constant 0 : i32
    return %c0_i32 : i32
  }
  func.func @transform_1(%arg0: i32) -> (i32, i32) {
    %c0_i32 = arith.constant 0 : i32
    %c0_i32_0 = arith.constant 0 : i32
    return %arg0, %c0_i32 : i32, i32
  }
  func.func @transform_2(%arg0: i32) -> (i32, i32) {
    %c0_i32 = arith.constant 0 : i32
    %c0_i32_0 = arith.constant 0 : i32
    return %arg0, %c0_i32 : i32, i32
  }
}

</mosaic_0001>

<bundles_post_ra>
// kernel: temp_classifier_forward.1
= control target key start
LH: loop header
LB: loop body
LE: loop exit
PB: predicated region body
PF: predicated region fallthrough
CT: control target
= control target key end

     0   :  { %7 = vsyncpa [#allocation3], 0  ;;  %s158_s12 = smov [#allocation2]   ;;  %s268_s0 = inlined_call_operand.vmem [shape: f32[18], index: 0, kind: input, shape index: {}]   ;;  %s269_s1 = inlined_call_operand.vmem [shape: f32[8,256], index: 1, kind: input, shape index: {}]   ;;  %s270_s2 = inlined_call_operand.vmem [shape: f32[8,256], index: 2, kind: output, shape index: {}]  }
   0x1   :  { %s13_s11 = sshll.u32 %s268_s0, 4  ;;  %s14_s11 = int_to_ptr.vmem [resolvable:$true] %s13_s11 }
   0x2   :  { %16 = dma.vmem_to_smem %s14_s11, 16, %s158_s12, [#allocation3]  }
   0x3   :  { %156 = dma.done.wait [#allocation3], 16  }
   0x4   :  { %157 = vsyncadd [#allocation3], 4294967280 }
   0x5   :  { %23 = sfence }
   0x6   :  { %v26_v0 = vlaneseq  ;;  %s177_s13 = sld [smem:[#allocation2 + $0x11]]  ;;  %v184_v4 = vld [vmem:[%s269_s1] sm:$0xff]  ;;  %v191_v5 = vld [vmem:[%s269_s1 + $0x8] sm:$0xff] }
   0x7   :  { %s179_s14 = sld [smem:[#allocation2 + $0x10]] }
   0x8   :  { %v27_v1 = vand.u32 127, %v26_v0  ;;  %s39_s15 = sld [smem:[#allocation2]] }
   0x9   :  { %s128_s16 = sld [smem:[#allocation2 + $0x4]] }
   0xa   :  { %v29_v2 = vand.u32 1, %v27_v1  ;;  %s129_s17 = sld [smem:[#allocation2 + $0x9]]  ;;  %v28_v3 = vadd.s32 128, %v27_v1 }
   0xb   :  { %s130_s18 = sld [smem:[#allocation2 + $0x8]] }
   0xc   :  { %s186_s20 = sld [smem:[#allocation2 + $0x1]]  ;;  %v30_v6 = vand.u32 1, %v28_v3  ;;  %vm195_vm0 = vcmp.eq.s32.totalorder %v29_v2, 1  ;;  %v35_v13 = vstv %s177_s13 }
   0xd   :  { %s193_s23 = sld [smem:[#allocation2 + $0x5]]  ;;  %v36_v15 = vstv %s179_s14 }
   0xe   :  { %v40_v8 = vstv %s39_s15  ;;  %s199_s24 = sld [smem:[#allocation2 + $0xb]]  ;;  %vm204_vm1 = vcmp.eq.s32.totalorder %v30_v6, 1  ;;  %v37_v26 = vsel %vm195_vm0, %v35_v13, %v36_v15 }
   0xf   :  { %v41_v9 = vmul.f32 %v40_v8, %v184_v4  ;;  %v44_v10 = vstv %s128_s16  ;;  %s202_s25 = sld [smem:[#allocation2 + $0xa]]  ;;  %v42_v12 = vmul.f32 %v40_v8, %v191_v5  ;;  %v38_v28 = vsel %vm204_vm1, %v35_v13, %v36_v15 }
  0x10   :  { %v51_v14 = vstv %s129_s17  ;;  %s210_s1 = sld [smem:[#allocation2 + $0x2]] }
  0x11   :  { %v45_v16 = vadd.f32 %v44_v10, %v41_v9  ;;  %v52_v17 = vstv %s130_s18  ;;  %s213_s26 = sld [smem:[#allocation2 + $0x6]]  ;;  %v46_v18 = vadd.f32 %v44_v10, %v42_v12 }
  0x12   :  { %v53_v19 = vsel %vm195_vm0, %v51_v14, %v52_v17  ;;  %v60_v20 = vstv %s186_s20  ;;  %s218_s27 = sld [smem:[#allocation2 + $0xd]]  ;;  %v54_v21 = vsel %vm204_vm1, %v51_v14, %v52_v17 }
  0x13   :  { %v47_v22 = vmax.f32 %v45_v16, 0.0  ;;  %v61_v23 = vmul.f32 %v60_v20, %v184_v4  ;;  %v64_v24 = vstv %s193_s23  ;;  %s224_s28 = sld [smem:[#allocation2 + $0xc]]  ;;  %v48_v25 = vmax.f32 %v46_v18, 0.0 }
  0x14   :  { %v71_v27 = vstv %s199_s24  ;;  %s229_s29 = sld [smem:[#allocation2 + $0x3]]  ;;  %v62_v29 = vmul.f32 %v60_v20, %v191_v5 }
  0x15   :  { %v55_v30 = vmul.f32 %v53_v19, %v47_v22  ;;  %v65_v31 = vadd.f32 %v64_v24, %v61_v23  ;;  %v72_v32 = vstv %s202_s25  ;;  %s235_s30 = sld [smem:[#allocation2 + $0x7]]  ;;  %v56_v33 = vmul.f32 %v54_v21, %v48_v25 }
  0x16   :  { %v73_v34 = vsel %vm195_vm0, %v71_v27, %v72_v32  ;;  %v80_v35 = vstv %s210_s1  ;;  %s240_s3 = sld [smem:[#allocation2 + $0xf]]  ;;  %v66_v36 = vadd.f32 %v64_v24, %v62_v29  ;;  %v74_v37 = vsel %vm204_vm1, %v71_v27, %v72_v32 }
  0x17   :  { %v57_v38 = vadd.f32 %v55_v30, %v37_v26  ;;  %v67_v39 = vmax.f32 %v65_v31, 0.0  ;;  %v81_v40 = vmul.f32 %v80_v35, %v184_v4  ;;  %v84_v41 = vstv %s213_s26  ;;  %s142_s4 = sld [smem:[#allocation2 + $0xe]] }
  0x18   :  { %v91_v42 = vstv %s218_s27  ;;  %v58_v43 = vadd.f32 %v56_v33, %v38_v28  ;;  %v68_v44 = vmax.f32 %v66_v36, 0.0  ;;  %v82_v45 = vmul.f32 %v80_v35, %v191_v5 }
  0x19   :  { %v75_v46 = vmul.f32 %v73_v34, %v67_v39  ;;  %v85_v47 = vadd.f32 %v84_v41, %v81_v40  ;;  %v92_v48 = vstv %s224_s28 }
  0x1a   :  { %v93_v49 = vsel %vm195_vm0, %v91_v42, %v92_v48  ;;  %v100_v50 = vstv %s229_s29  ;;  %v76_v51 = vmul.f32 %v74_v37, %v68_v44  ;;  %v86_v52 = vadd.f32 %v84_v41, %v82_v45 }
  0x1b   :  { %v77_v53 = vadd.f32 %v75_v46, %v57_v38  ;;  %v87_v54 = vmax.f32 %v85_v47, 0.0  ;;  %v101_v55 = vmul.f32 %v100_v50, %v184_v4  ;;  %v104_v56 = vstv %s235_s30 }
  0x1c   :  { %v111_v57 = vstv %s240_s3  ;;  %v78_v58 = vadd.f32 %v76_v51, %v58_v43  ;;  %v88_v59 = vmax.f32 %v86_v52, 0.0  ;;  %v94_v60 = vsel %vm204_vm1, %v91_v42, %v92_v48 }
  0x1d   :  { %v95_v61 = vmul.f32 %v93_v49, %v87_v54  ;;  %v105_v62 = vadd.f32 %v104_v56, %v101_v55  ;;  %v112_v63 = vstv %s142_s4  ;;  %v102_v0 = vmul.f32 %v100_v50, %v191_v5 }
  0x1e   :  { %v113_v1 = vsel %vm195_vm0, %v111_v57, %v112_v63  ;;  %v96_v2 = vmul.f32 %v94_v60, %v88_v59  ;;  %v114_v4 = vsel %vm204_vm1, %v111_v57, %v112_v63 }
  0x1f   :  { %v97_v3 = vadd.f32 %v95_v61, %v77_v53  ;;  %v107_v6 = vmax.f32 %v105_v62, 0.0  ;;  %v106_v8 = vadd.f32 %v104_v56, %v102_v0 }
  0x20   :  { %v98_v10 = vadd.f32 %v96_v2, %v78_v58 }
  0x21   :  { %v115_v9 = vmul.f32 %v113_v1, %v107_v6  ;;  %v108_v12 = vmax.f32 %v106_v8, 0.0 }
  0x23   :  { %v117_v13 = vadd.f32 %v115_v9, %v97_v3  ;;  %v116_v14 = vmul.f32 %v114_v4, %v108_v12 }
  0x25   :  { %119 = vst [vmem:[%s270_s2] sm:$0xff] %v117_v13  ;;  %v118_v5 = vadd.f32 %v116_v14, %v98_v10 }
  0x27   :  { %120 = vst [vmem:[%s270_s2 + $0x8] sm:$0xff] %v118_v5 }
  0x28   :  { %125 = vsyncpa [#allocation3], 1 }

</bundles_post_ra>
